<compile_context>
chip_gen: v6e
topology: v6e:2x2x1
jax: 0.10.0
libtpu: 0.0.40
codegen_flags: <defaults>
</compile_context>

<pallas_src>
import jax
import jax.numpy as jnp
from jax import lax
from jax.experimental import pallas as pl
from jax.experimental.pallas import tpu as pltpu


_GOLDEN = 0x9E3779B9
_FMIX1 = 0x85EBCA6B
_FMIX2 = 0xC2B2AE35


def _mask_kernel(seed_ref, ratio_ref, o_ref):
    tile_r, tile_c = o_ref.shape

    # Global element index of every slot in this output tile.
    row = lax.broadcasted_iota(jnp.int32, (tile_r, tile_c), 0)
    col = lax.broadcasted_iota(jnp.int32, (tile_r, tile_c), 1)
    row_off = pl.program_id(0) * tile_r
    gidx = (row_off + row) * tile_c + col                      # unique per element

    # Counter-based PRNG: murmur3 fmix32 of (index, seed).
    x = gidx.astype(jnp.uint32) + seed_ref[0].astype(jnp.uint32) * jnp.uint32(_GOLDEN)
    x = x ^ (x >> jnp.uint32(16))
    x = x * jnp.uint32(_FMIX1)
    x = x ^ (x >> jnp.uint32(13))
    x = x * jnp.uint32(_FMIX2)
    x = x ^ (x >> jnp.uint32(16))

    # Uniform float in [0, 1) with 24-bit resolution (matches torch.rand range,
    # so mask_ratio == 0.0 -> nothing masked, mask_ratio == 1.0 -> all masked).
    u = (x >> jnp.uint32(8)).astype(jnp.int32).astype(jnp.float32) * jnp.float32(2.0 ** -24)

    # 1.0 where masked (u < mask_ratio), 0.0 otherwise — matches torch .float()
    o_ref[...] = (u < ratio_ref[0]).astype(jnp.float32)


def mask_generator(input_data, mask_ratio, seed=0):
    """JAX/Pallas equivalent of MaskGenerator.forward.

    Args:
        input_data: array of shape [B, N, L, D] (values unused, shape only).
        mask_ratio: python float / scalar mask ratio.
        seed: integer PRNG seed (torch.rand uses the global RNG state; here we
              make it explicit and deterministic).
    Returns:
        float32 array [B, N, L]; 1.0 = masked, 0.0 = unmasked.
    """
    B, N, L, _ = input_data.shape
    total = B * N * L

    # Lane-dense tiling: flat slab (rows, TILE_C), TILE_C multiple of 128.
    TILE_C = 2048
    rows_needed = -(-total // TILE_C)                 # cdiv
    TILE_R = min(512, ((rows_needed + 7) // 8) * 8)   # multiple of 8, capped (<=4 MiB tile)
    num_tiles = -(-rows_needed // TILE_R)
    rows_padded = num_tiles * TILE_R

    seed_arr = jnp.asarray([seed], dtype=jnp.int32)
    ratio_arr = jnp.asarray([mask_ratio], dtype=jnp.float32)

    out = pl.pallas_call(
        _mask_kernel,
        grid=(num_tiles,),
        out_shape=jax.ShapeDtypeStruct((rows_padded, TILE_C), jnp.float32),
        in_specs=[
            pl.BlockSpec(memory_space=pltpu.MemorySpace.SMEM),  # seed scalar
            pl.BlockSpec(memory_space=pltpu.MemorySpace.SMEM),  # mask_ratio scalar
        ],
        out_specs=pl.BlockSpec((TILE_R, TILE_C), lambda i: (i, 0)),
        compiler_params=pltpu.CompilerParams(
            dimension_semantics=("parallel",),        # shard grid across TCs (v7x)
        ),
    )(seed_arr, ratio_arr)

    return out.reshape(-1)[:total].reshape(B, N, L)


if __name__ == "__main__":
    key = jax.random.PRNGKey(0)
    B, N, L, D = 2, 4, 8, 32
    input_data = jax.random.normal(key, (B, N, L, D), dtype=jnp.float32)
    mask_ratio = 0.5

    mask = jax.block_until_ready(mask_generator(input_data, mask_ratio, seed=0))

    # Sanity checks on semantics: shape, dtype, binary values.
    assert mask.shape == (B, N, L), mask.shape
    assert mask.dtype == jnp.float32, mask.dtype
    assert bool(jnp.all((mask == 0.0) | (mask == 1.0)))

    # Mask fraction should be roughly mask_ratio (loose bound for 64 samples).
    frac = float(mask.mean())
    assert 0.15 < frac < 0.85, frac

    # mask_ratio = 0 -> no masking;  mask_ratio = 1 -> everything masked.
    m0 = jax.block_until_ready(mask_generator(input_data, 0.0, seed=1))
    m1 = jax.block_until_ready(mask_generator(input_data, 1.0, seed=2))
    assert float(m0.sum()) == 0.0
    assert float(m1.sum()) == float(B * N * L)

    print("KERNEL_OK")
</pallas_src>

<mosaic_0001>
module attributes {stable_mosaic.version = 11 : i64} {
  func.func @_mask_kernel(%arg0: i32, %arg1: memref<1xi32, #tpu.memory_space<smem>>, %arg2: memref<1xf32, #tpu.memory_space<smem>>, %arg3: memref<8x2048xf32, #tpu.memory_space<vmem>>) attributes {dimension_semantics = [#tpu.dimension_semantics<parallel>], iteration_bounds = array<i64: 1>, scalar_prefetch = 0 : i64, scratch_operands = 0 : i64, tpu.core_type = #tpu.core_type<tc>, window_params = [{transform_indices = @transform_0, window_bounds = array<i64: 1>}, {transform_indices = @transform_1, window_bounds = array<i64: 1>}, {transform_indices = @transform_2, window_bounds = array<i64: 8, 2048>}]} {
    %0 = tpu.iota {dimensions = array<i32: 0>} : vector<8x2048xi32>
    %1 = tpu.iota {dimensions = array<i32: 1>} : vector<8x2048xi32>
    %c8_i32 = arith.constant 8 : i32
    %2 = arith.muli %arg0, %c8_i32 : i32
    %3 = vector.broadcast %2 : i32 to vector<8x2048xi32>
    %4 = arith.addi %3, %0 : vector<8x2048xi32>
    %c2048_i32 = arith.constant 2048 : i32
    %5 = vector.broadcast %c2048_i32 : i32 to vector<8x2048xi32>
    %6 = arith.muli %4, %5 : vector<8x2048xi32>
    %7 = arith.addi %6, %1 : vector<8x2048xi32>
    %c0 = arith.constant 0 : index
    %8 = memref.load %arg1[%c0] : memref<1xi32, #tpu.memory_space<smem>>
    %c-1640531527_i32 = arith.constant -1640531527 : i32
    %9 = arith.muli %8, %c-1640531527_i32 : i32
    %10 = vector.broadcast %9 : i32 to vector<8x2048xi32>
    %11 = arith.addi %7, %10 : vector<8x2048xi32>
    %c16_i32 = arith.constant 16 : i32
    %12 = vector.broadcast %c16_i32 : i32 to vector<8x2048xi32>
    %13 = arith.shrui %11, %12 : vector<8x2048xi32>
    %14 = arith.xori %11, %13 : vector<8x2048xi32>
    %c-2048144789_i32 = arith.constant -2048144789 : i32
    %15 = vector.broadcast %c-2048144789_i32 : i32 to vector<8x2048xi32>
    %16 = arith.muli %14, %15 : vector<8x2048xi32>
    %c13_i32 = arith.constant 13 : i32
    %17 = vector.broadcast %c13_i32 : i32 to vector<8x2048xi32>
    %18 = arith.shrui %16, %17 : vector<8x2048xi32>
    %19 = arith.xori %16, %18 : vector<8x2048xi32>
    %c-1028477387_i32 = arith.constant -1028477387 : i32
    %20 = vector.broadcast %c-1028477387_i32 : i32 to vector<8x2048xi32>
    %21 = arith.muli %19, %20 : vector<8x2048xi32>
    %c16_i32_0 = arith.constant 16 : i32
    %22 = vector.broadcast %c16_i32_0 : i32 to vector<8x2048xi32>
    %23 = arith.shrui %21, %22 : vector<8x2048xi32>
    %24 = arith.xori %21, %23 : vector<8x2048xi32>
    %c8_i32_1 = arith.constant 8 : i32
    %25 = vector.broadcast %c8_i32_1 : i32 to vector<8x2048xi32>
    %26 = arith.shrui %24, %25 : vector<8x2048xi32>
    %27 = arith.sitofp %26 : vector<8x2048xi32> to vector<8x2048xf32>
    %cst = arith.constant 5.96046448E-8 : f32
    %28 = vector.broadcast %cst : f32 to vector<8x2048xf32>
    %29 = arith.mulf %27, %28 : vector<8x2048xf32>
    %c0_2 = arith.constant 0 : index
    %30 = memref.load %arg2[%c0_2] : memref<1xf32, #tpu.memory_space<smem>>
    %31 = vector.broadcast %30 : f32 to vector<8x2048xf32>
    %32 = arith.cmpf olt, %29, %31 : vector<8x2048xf32>
    %33 = arith.extui %32 : vector<8x2048xi1> to vector<8x2048xi32>
    %34 = arith.sitofp %33 : vector<8x2048xi32> to vector<8x2048xf32>
    %c0_3 = arith.constant 0 : index
    %c0_4 = arith.constant 0 : index
    %35 = vector.load %arg3[%c0_3, %c0_4] : memref<8x2048xf32, #tpu.memory_space<vmem>>, vector<8x2048xf32>
    tpu.vector_store %arg3[%c0_3, %c0_4], %34 {strides = array<i32>} : memref<8x2048xf32, #tpu.memory_space<vmem>>, vector<8x2048xf32>,
    return
  }
  func.func @transform_0(%arg0: i32) -> i32 {
    %c0_i32 = arith.constant 0 : i32
    %c0_i32_0 = arith.constant 0 : i32
    return %c0_i32 : i32
  }
  func.func @transform_1(%arg0: i32) -> i32 {
    %c0_i32 = arith.constant 0 : i32
    %c0_i32_0 = arith.constant 0 : i32
    return %c0_i32 : i32
  }
  func.func @transform_2(%arg0: i32) -> (i32, i32) {
    %c0_i32 = arith.constant 0 : i32
    %c0_i32_0 = arith.constant 0 : i32
    return %arg0, %c0_i32 : i32, i32
  }
}

</mosaic_0001>

<bundles_post_ra>
// kernel: tpu_custom_call.1
= control target key start
LH: loop header
LB: loop body
LE: loop exit
PB: predicated region body
PF: predicated region fallthrough
CT: control target
= control target key end

     0   :  { %v14_v0 = vlaneseq  ;;  %s494_s0 = inlined_call_operand.<no memory space> [shape: s32[1], index: 0, kind: input, shape index: {}]   ;;  %s495_s1 = inlined_call_operand.<no memory space> [shape: f32[1], index: 1, kind: input, shape index: {}]   ;;  %s496_s2 = inlined_call_operand.hbm [shape: f32[8,2048], index: 2, kind: output, shape index: {}]  }
   0x1   :  { %s54_s11 = smul.u32 2654435769, %s494_s0 }
   0x2   :  { %9 = vsyncpa [#allocation5], 0  ;;  %v15_v1 = vshrl.u32 %v14_v0, 7  ;;  %v388_v2 = vand.u32 127, %v14_v0  ;;  %v395_v4 = vstv %s495_s1  ;;  %s369_s0 = smov [#allocation4]  }
   0x3   :  { %v390_v3 = vstv %s54_s11  ;;  %s320_s1 = sshll.u32 %s369_s0, 4  ;;  %s321_s1 = int_to_ptr.vmem [resolvable:$true] %s320_s1 }
   0x4   :  { %v397_v5 = vmul.u32 2048, %v15_v1  ;;  %v18_v6 = vadd.s32 128, %v388_v2  ;;  %v19_v7 = vadd.s32 256, %v388_v2  ;;  %v20_v8 = vadd.s32 384, %v388_v2  ;;  %s346_s14 = scalar_lea.vmem %s321_s1, 2048  ;;  %p351_p1 = scmp.lt.s32.totalorder %s321_s1, %s321_s1 }
   0x5   :  { %v21_v9 = vadd.s32 512, %v388_v2  ;;  %v22_v10 = vadd.s32 640, %v388_v2  ;;  %v23_v11 = vadd.s32 768, %v388_v2  ;;  %v24_v12 = vadd.s32 896, %v388_v2  ;;  %p347_p0 = scmp.ne.s32.totalorder %s321_s1, %s346_s14  ;;  %p352_p2 = scmp.lt.s32.totalorder %s346_s14, %s346_s14 }
   0x6   :  { %v37_v13 = vadd.s32 %v397_v5, %v388_v2  ;;  %v38_v14 = vadd.s32 %v397_v5, %v18_v6  ;;  %v39_v15 = vadd.s32 %v397_v5, %v19_v7  ;;  %v40_v16 = vadd.s32 %v397_v5, %v20_v8 }
   0x7   :  { %v41_v17 = vadd.s32 %v397_v5, %v21_v9  ;;  %v42_v18 = vadd.s32 %v397_v5, %v22_v10  ;;  %v43_v19 = vadd.s32 %v397_v5, %v23_v11  ;;  %v44_v20 = vadd.s32 %v397_v5, %v24_v12  ;;  %p353_p3 = por %p352_p2, %p351_p1 }
   0x8   :  { %v56_v21 = vadd.s32 %v390_v3, %v37_v13  ;;  %v57_v22 = vadd.s32 %v390_v3, %v38_v14  ;;  %v58_v23 = vadd.s32 %v390_v3, %v39_v15  ;;  %v59_v24 = vadd.s32 %v390_v3, %v40_v16 }
   0x9   :  { %v60_v25 = vadd.s32 %v390_v3, %v41_v17  ;;  %v61_v26 = vadd.s32 %v390_v3, %v42_v18  ;;  %v62_v27 = vadd.s32 %v390_v3, %v43_v19  ;;  %v63_v28 = vadd.s32 %v390_v3, %v44_v20  ;;  %p354_p4 = pnand %p353_p3, %p347_p0 }
   0xa   :  { %v72_v29 = vshrl.u32 %v56_v21, 16  ;;  %v73_v30 = vshrl.u32 %v57_v22, 16  ;;  %v74_v31 = vshrl.u32 %v58_v23, 16  ;;  %v75_v32 = vshrl.u32 %v59_v24, 16 }
   0xb   :  { %v76_v33 = vshrl.u32 %v60_v25, 16  ;;  %v77_v34 = vshrl.u32 %v61_v26, 16  ;;  %v78_v35 = vshrl.u32 %v62_v27, 16  ;;  %v79_v36 = vshrl.u32 %v63_v28, 16 }
   0xc   :  { %v88_v37 = vxor.u32 %v72_v29, %v56_v21  ;;  %v89_v38 = vxor.u32 %v73_v30, %v57_v22  ;;  %v90_v39 = vxor.u32 %v74_v31, %v58_v23  ;;  %v91_v40 = vxor.u32 %v75_v32, %v59_v24 }
   0xd   :  { %v92_v41 = vxor.u32 %v76_v33, %v60_v25  ;;  %v93_v42 = vxor.u32 %v77_v34, %v61_v26  ;;  %v94_v43 = vxor.u32 %v78_v35, %v62_v27  ;;  %v95_v44 = vxor.u32 %v79_v36, %v63_v28 }
   0xe   :  { %v104_v45 = vmul.u32 2246822507, %v88_v37  ;;  %v105_v46 = vmul.u32 2246822507, %v89_v38  ;;  %v424_v47 = vadd.s32 1024, %v388_v2  ;;  %v427_v48 = vadd.s32 1152, %v388_v2 }
   0xf   :  { %v106_v49 = vmul.u32 2246822507, %v90_v39  ;;  %v107_v50 = vmul.u32 2246822507, %v91_v40  ;;  %v430_v51 = vadd.s32 1280, %v388_v2  ;;  %v433_v52 = vadd.s32 1408, %v388_v2 }
  0x10   :  { %v120_v53 = vshrl.u32 %v104_v45, 13  ;;  %v121_v54 = vshrl.u32 %v105_v46, 13  ;;  %v108_v55 = vmul.u32 2246822507, %v92_v41  ;;  %v109_v56 = vmul.u32 2246822507, %v93_v42 }
  0x11   :  { %v122_v57 = vshrl.u32 %v106_v49, 13  ;;  %v123_v58 = vshrl.u32 %v107_v50, 13  ;;  %v110_v59 = vmul.u32 2246822507, %v94_v43  ;;  %v111_v60 = vmul.u32 2246822507, %v95_v44 }
  0x12   :  { %v136_v61 = vxor.u32 %v120_v53, %v104_v45  ;;  %v137_v62 = vxor.u32 %v121_v54, %v105_v46  ;;  %v124_v63 = vshrl.u32 %v108_v55, 13  ;;  %v125_v0 = vshrl.u32 %v109_v56, 13 }
  0x13   :  { %v138_v1 = vxor.u32 %v122_v57, %v106_v49  ;;  %v139_v6 = vxor.u32 %v123_v58, %v107_v50  ;;  %v126_v7 = vshrl.u32 %v110_v59, 13  ;;  %v127_v8 = vshrl.u32 %v111_v60, 13 }
  0x14   :  { %v152_v9 = vmul.u32 3266489909, %v136_v61  ;;  %v153_v10 = vmul.u32 3266489909, %v137_v62  ;;  %v140_v11 = vxor.u32 %v124_v63, %v108_v55  ;;  %v141_v12 = vxor.u32 %v125_v0, %v109_v56 }
  0x15   :  { %v154_v13 = vmul.u32 3266489909, %v138_v1  ;;  %v155_v14 = vmul.u32 3266489909, %v139_v6  ;;  %v142_v15 = vxor.u32 %v126_v7, %v110_v59  ;;  %v143_v16 = vxor.u32 %v127_v8, %v111_v60 }
  0x16   :  { %v168_v17 = vshrl.u32 %v152_v9, 16  ;;  %v169_v18 = vshrl.u32 %v153_v10, 16  ;;  %v156_v19 = vmul.u32 3266489909, %v140_v11  ;;  %v157_v20 = vmul.u32 3266489909, %v141_v12 }
  0x17   :  { %v170_v21 = vshrl.u32 %v154_v13, 16  ;;  %v171_v22 = vshrl.u32 %v155_v14, 16  ;;  %v158_v23 = vmul.u32 3266489909, %v142_v15  ;;  %v159_v24 = vmul.u32 3266489909, %v143_v16 }
  0x18   :  { %v184_v25 = vxor.u32 %v168_v17, %v152_v9  ;;  %v185_v26 = vxor.u32 %v169_v18, %v153_v10  ;;  %v172_v27 = vshrl.u32 %v156_v19, 16  ;;  %v173_v28 = vshrl.u32 %v157_v20, 16 }
  0x19   :  { %v186_v29 = vxor.u32 %v170_v21, %v154_v13  ;;  %v187_v30 = vxor.u32 %v171_v22, %v155_v14  ;;  %v174_v31 = vshrl.u32 %v158_v23, 16  ;;  %v175_v32 = vshrl.u32 %v159_v24, 16 }
  0x1a   :  { %v200_v33 = vshrl.u32 %v184_v25, 8  ;;  %v201_v34 = vshrl.u32 %v185_v26, 8  ;;  %v188_v35 = vxor.u32 %v172_v27, %v156_v19  ;;  %v189_v36 = vxor.u32 %v173_v28, %v157_v20 }
  0x1b   :  { %v202_v37 = vshrl.u32 %v186_v29, 8  ;;  %v203_v38 = vshrl.u32 %v187_v30, 8  ;;  %v190_v39 = vxor.u32 %v174_v31, %v158_v23  ;;  %v191_v40 = vxor.u32 %v175_v32, %v159_v24 }
  0x1c   :  { %v216_v41 = vcvt.s32.f32 %v200_v33  ;;  %v217_v42 = vcvt.s32.f32 %v201_v34  ;;  %v204_v43 = vshrl.u32 %v188_v35, 8  ;;  %v205_v44 = vshrl.u32 %v189_v36, 8 }
  0x1d   :  { %v218_v45 = vcvt.s32.f32 %v202_v37  ;;  %v219_v46 = vcvt.s32.f32 %v203_v38  ;;  %v206_v49 = vshrl.u32 %v190_v39, 8  ;;  %v207_v50 = vshrl.u32 %v191_v40, 8 }
  0x1e   :  { %v232_v53 = vmul.f32 5.9604645e-08, %v216_v41  ;;  %v233_v54 = vmul.f32 5.9604645e-08, %v217_v42  ;;  %v220_v55 = vcvt.s32.f32 %v204_v43  ;;  %v221_v56 = vcvt.s32.f32 %v205_v44 }
  0x1f   :  { %v234_v57 = vmul.f32 5.9604645e-08, %v218_v45  ;;  %v235_v58 = vmul.f32 5.9604645e-08, %v219_v46  ;;  %v222_v59 = vcvt.s32.f32 %v206_v49  ;;  %v223_v60 = vcvt.s32.f32 %v207_v50 }
  0x20   :  { %vm250_vm0 = vcmp.lt.f32.partialorder %v232_v53, %v395_v4  ;;  %vm251_vm1 = vcmp.lt.f32.partialorder %v233_v54, %v395_v4  ;;  %v236_v61 = vmul.f32 5.9604645e-08, %v220_v55  ;;  %v237_v62 = vmul.f32 5.9604645e-08, %v221_v56 }
  0x21   :  { %v368_v63 = vmov 0.0   ;;  %vm252_vm2 = vcmp.lt.f32.partialorder %v234_v57, %v395_v4  ;;  %vm253_vm3 = vcmp.lt.f32.partialorder %v235_v58, %v395_v4  ;;  %v238_v10 = vmul.f32 5.9604645e-08, %v222_v59 }
  0x22   :  { %v328_v0 = vsel %vm250_vm0, 1.0, %v368_v63  ;;  %v329_v1 = vsel %vm251_vm1, 1.0, %v368_v63  ;;  %v330_v6 = vsel %vm252_vm2, 1.0, %v368_v63  ;;  %v331_v7 = vsel %vm253_vm3, 1.0, %v368_v63 }
  0x23   :  { %298 = vst [vmem:[#allocation4] sm:$0xff] %v328_v0  ;;  %299 = vst [vmem:[#allocation4 + $0x8] sm:$0xff] %v329_v1  ;;  %vm254_vm4 = vcmp.lt.f32.partialorder %v236_v61, %v395_v4  ;;  %vm255_vm5 = vcmp.lt.f32.partialorder %v237_v62, %v395_v4  ;;  %v239_v11 = vmul.f32 5.9604645e-08, %v223_v60  ;;  %v45_v12 = vadd.s32 %v397_v5, %v424_v47 }
  0x24   :  { %300 = vst [vmem:[#allocation4 + $0x10] sm:$0xff] %v330_v6  ;;  %301 = vst [vmem:[#allocation4 + $0x18] sm:$0xff] %v331_v7  ;;  %v332_v8 = vsel %vm254_vm4, 1.0, %v368_v63  ;;  %v333_v9 = vsel %vm255_vm5, 1.0, %v368_v63  ;;  %v46_v13 = vadd.s32 %v397_v5, %v427_v48  ;;  %v47_v14 = vadd.s32 %v397_v5, %v430_v51 }
  0x25   :  { %302 = vst [vmem:[#allocation4 + $0x20] sm:$0xff] %v332_v8  ;;  %303 = vst [vmem:[#allocation4 + $0x28] sm:$0xff] %v333_v9  ;;  %v48_v15 = vadd.s32 %v397_v5, %v433_v52  ;;  %vm256_vm6 = vcmp.lt.f32.partialorder %v238_v10, %v395_v4  ;;  %vm257_vm7 = vcmp.lt.f32.partialorder %v239_v11, %v395_v4  ;;  %v29_v16 = vadd.s32 1536, %v388_v2 }
  0x26   :  { %v30_v17 = vadd.s32 1664, %v388_v2  ;;  %v334_v18 = vsel %vm256_vm6, 1.0, %v368_v63  ;;  %v335_v47 = vsel %vm257_vm7, 1.0, %v368_v63  ;;  %v64_v48 = vadd.s32 %v390_v3, %v45_v12 }
  0x27   :  { %v65_v19 = vadd.s32 %v390_v3, %v46_v13  ;;  %304 = vst [vmem:[#allocation4 + $0x30] sm:$0xff] %v334_v18  ;;  %305 = vst [vmem:[#allocation4 + $0x38] sm:$0xff] %v335_v47  ;;  %v66_v51 = vadd.s32 %v390_v3, %v47_v14  ;;  %v67_v52 = vadd.s32 %v390_v3, %v48_v15  ;;  %v31_v24 = vadd.s32 1792, %v388_v2 }
  0x28   :  { %v49_v20 = vadd.s32 %v397_v5, %v29_v16  ;;  %v50_v21 = vadd.s32 %v397_v5, %v30_v17  ;;  %v80_v22 = vshrl.u32 %v64_v48, 16  ;;  %v32_v25 = vadd.s32 1920, %v388_v2 }
  0x29   :  { %v81_v23 = vshrl.u32 %v65_v19, 16  ;;  %v82_v26 = vshrl.u32 %v66_v51, 16  ;;  %v83_v27 = vshrl.u32 %v67_v52, 16  ;;  %v51_v32 = vadd.s32 %v397_v5, %v31_v24 }
  0x2a   :  { %v68_v28 = vadd.s32 %v390_v3, %v49_v20  ;;  %v69_v29 = vadd.s32 %v390_v3, %v50_v21  ;;  %v96_v30 = vxor.u32 %v80_v22, %v64_v48  ;;  %v52_v33 = vadd.s32 %v397_v5, %v32_v25 }
  0x2b   :  { %v97_v31 = vxor.u32 %v81_v23, %v65_v19  ;;  %v98_v34 = vxor.u32 %v82_v26, %v66_v51  ;;  %v99_v35 = vxor.u32 %v83_v27, %v67_v52  ;;  %v70_v2 = vadd.s32 %v390_v3, %v51_v32 }
  0x2c   :  { %v84_v36 = vshrl.u32 %v68_v28, 16  ;;  %v85_v37 = vshrl.u32 %v69_v29, 16  ;;  %v112_v38 = vmul.u32 2246822507, %v96_v30  ;;  %v71_v40 = vadd.s32 %v390_v3, %v52_v33 }
  0x2d   :  { %v113_v39 = vmul.u32 2246822507, %v97_v31  ;;  %v114_v41 = vmul.u32 2246822507, %v98_v34  ;;  %v86_v49 = vshrl.u32 %v70_v2, 16 }
  0x2e   :  { %v115_v42 = vmul.u32 2246822507, %v99_v35  ;;  %v100_v43 = vxor.u32 %v84_v36, %v68_v28  ;;  %v101_v44 = vxor.u32 %v85_v37, %v69_v29  ;;  %v128_v45 = vshrl.u32 %v112_v38, 13 }
  0x2f   :  { %v129_v46 = vshrl.u32 %v113_v39, 13  ;;  %v87_v50 = vshrl.u32 %v71_v40, 16  ;;  %v130_v53 = vshrl.u32 %v114_v41, 13  ;;  %v102_v58 = vxor.u32 %v86_v49, %v70_v2 }
  0x30   :  { %v131_v5 = vshrl.u32 %v115_v42, 13  ;;  %v116_v54 = vmul.u32 2246822507, %v100_v43  ;;  %v117_v55 = vmul.u32 2246822507, %v101_v44  ;;  %v144_v56 = vxor.u32 %v128_v45, %v112_v38 }
  0x31   :  { %v145_v57 = vxor.u32 %v129_v46, %v113_v39  ;;  %v103_v59 = vxor.u32 %v87_v50, %v71_v40  ;;  %v146_v60 = vxor.u32 %v130_v53, %v114_v41  ;;  %v118_v12 = vmul.u32 2246822507, %v102_v58 }
  0x32   :  { %v147_v61 = vxor.u32 %v131_v5, %v115_v42  ;;  %v132_v62 = vshrl.u32 %v116_v54, 13  ;;  %v133_v3 = vshrl.u32 %v117_v55, 13  ;;  %v160_v0 = vmul.u32 3266489909, %v144_v56 }
  0x33   :  { %v161_v1 = vmul.u32 3266489909, %v145_v57  ;;  %v162_v6 = vmul.u32 3266489909, %v146_v60  ;;  %v134_v48 = vshrl.u32 %v118_v12, 13 }
  0x34   :  { %v163_v7 = vmul.u32 3266489909, %v147_v61  ;;  %v148_v8 = vxor.u32 %v132_v62, %v116_v54  ;;  %v149_v9 = vxor.u32 %v133_v3, %v117_v55  ;;  %v176_v10 = vshrl.u32 %v160_v0, 16 }
  0x35   :  { %v177_v11 = vshrl.u32 %v161_v1, 16  ;;  %v119_v13 = vmul.u32 2246822507, %v103_v59  ;;  %v178_v14 = vshrl.u32 %v162_v6, 16  ;;  %v150_v24 = vxor.u32 %v134_v48, %v118_v12 }
  0x36   :  { %v179_v15 = vshrl.u32 %v163_v7, 16  ;;  %v164_v16 = vmul.u32 3266489909, %v148_v8  ;;  %v165_v17 = vmul.u32 3266489909, %v149_v9  ;;  %v192_v18 = vxor.u32 %v176_v10, %v160_v0 }
  0x37   :  { %v193_v47 = vxor.u32 %v177_v11, %v161_v1  ;;  %v135_v19 = vshrl.u32 %v119_v13, 13  ;;  %v194_v51 = vxor.u32 %v178_v14, %v162_v6  ;;  %v166_v32 = vmul.u32 3266489909, %v150_v24 }
  0x38   :  { %v195_v52 = vxor.u32 %v179_v15, %v163_v7  ;;  %v180_v20 = vshrl.u32 %v164_v16, 16  ;;  %v181_v21 = vshrl.u32 %v165_v17, 16  ;;  %v208_v22 = vshrl.u32 %v192_v18, 8 }
  0x39   :  { %v209_v23 = vshrl.u32 %v193_v47, 8  ;;  %v151_v25 = vxor.u32 %v135_v19, %v119_v13  ;;  %v210_v26 = vshrl.u32 %v194_v51, 8  ;;  %v182_v2 = vshrl.u32 %v166_v32, 16 }
  0x3a   :  { %v211_v27 = vshrl.u32 %v195_v52, 8  ;;  %v196_v28 = vxor.u32 %v180_v20, %v164_v16  ;;  %v197_v29 = vxor.u32 %v181_v21, %v165_v17  ;;  %v224_v30 = vcvt.s32.f32 %v208_v22 }
  0x3b   :  { %v225_v31 = vcvt.s32.f32 %v209_v23  ;;  %v167_v33 = vmul.u32 3266489909, %v151_v25  ;;  %v226_v34 = vcvt.s32.f32 %v210_v26  ;;  %v198_v45 = vxor.u32 %v182_v2, %v166_v32 }
  0x3c   :  { %v227_v35 = vcvt.s32.f32 %v211_v27  ;;  %v212_v36 = vshrl.u32 %v196_v28, 8  ;;  %v213_v37 = vshrl.u32 %v197_v29, 8  ;;  %v240_v38 = vmul.f32 5.9604645e-08, %v224_v30 }
  0x3d   :  { %v241_v39 = vmul.f32 5.9604645e-08, %v225_v31  ;;  %v183_v40 = vshrl.u32 %v167_v33, 16  ;;  %v242_v41 = vmul.f32 5.9604645e-08, %v226_v34  ;;  %v214_v56 = vshrl.u32 %v198_v45, 8 }
  0x3e   :  { %v243_v42 = vmul.f32 5.9604645e-08, %v227_v35  ;;  %v228_v43 = vcvt.s32.f32 %v212_v36  ;;  %v229_v44 = vcvt.s32.f32 %v213_v37  ;;  %vm258_vm8 = vcmp.lt.f32.partialorder %v240_v38, %v395_v4 }
  0x3f   :  { %vm259_vm9 = vcmp.lt.f32.partialorder %v241_v39, %v395_v4  ;;  %v199_v46 = vxor.u32 %v183_v40, %v167_v33  ;;  %v336_v49 = vsel %vm258_vm8, 1.0, %v368_v63  ;;  %vm260_vm10 = vcmp.lt.f32.partialorder %v242_v41, %v395_v4 }
  0x40   :  { %v337_v50 = vsel %vm259_vm9, 1.0, %v368_v63  ;;  %vm261_vm11 = vcmp.lt.f32.partialorder %v243_v42, %v395_v4  ;;  %306 = vst [vmem:[#allocation4 + $0x40] sm:$0xff] %v336_v49  ;;  %v338_v53 = vsel %vm260_vm10, 1.0, %v368_v63  ;;  %v244_v54 = vmul.f32 5.9604645e-08, %v228_v43 }
  0x41   :  { %307 = vst [vmem:[#allocation4 + $0x48] sm:$0xff] %v337_v50  ;;  %v339_v5 = vsel %vm261_vm11, 1.0, %v368_v63  ;;  %v245_v55 = vmul.f32 5.9604645e-08, %v229_v44  ;;  %308 = vst [vmem:[#allocation4 + $0x50] sm:$0xff] %v338_v53  ;;  %v215_v57 = vshrl.u32 %v199_v46, 8  ;;  %v230_v60 = vcvt.s32.f32 %v214_v56 }
  0x42   :  { %309 = vst [vmem:[#allocation4 + $0x58] sm:$0xff] %v339_v5  ;;  %vm262_vm12 = vcmp.lt.f32.partialorder %v244_v54, %v395_v4 }
  0x43   :  { %vm263_vm13 = vcmp.lt.f32.partialorder %v245_v55, %v395_v4  ;;  %v340_v58 = vsel %vm262_vm12, 1.0, %v368_v63  ;;  %v231_v61 = vcvt.s32.f32 %v215_v57  ;;  %v246_v62 = vmul.f32 5.9604645e-08, %v230_v60 }
  0x44   :  { %v341_v59 = vsel %vm263_vm13, 1.0, %v368_v63  ;;  %310 = vst [vmem:[#allocation4 + $0x60] sm:$0xff] %v340_v58 }
  0x45   :  { %311 = vst [vmem:[#allocation4 + $0x68] sm:$0xff] %v341_v59  ;;  %v247_v3 = vmul.f32 5.9604645e-08, %v231_v61  ;;  %vm264_vm14 = vcmp.lt.f32.partialorder %v246_v62, %v395_v4 }
  0x46   :  { %v342_v0 = vsel %vm264_vm14, 1.0, %v368_v63 }
  0x47   :  { %vm265_vm15 = vcmp.lt.f32.partialorder %v247_v3, %v395_v4  ;;  %312 = vst [vmem:[#allocation4 + $0x70] sm:$0xff] %v342_v0 }
  0x48   :  { %v343_v1 = vsel %vm265_vm15, 1.0, %v368_v63 }
  0x49   :  { %313 = vst [vmem:[#allocation4 + $0x78] sm:$0xff] %v343_v1 }
  0x4a   :  { %357 = shalt.err (!%p354_p4)
}
  0x4b   :  { %323 = dma.vmem_to_hbm [thread:$0]  %s321_s1, 2048, %s496_s2, [#allocation5]  }
  0x4c   :  { %366 = dma.done.wait [#allocation5], 2048  }
  0x4d   :  { %367 = vsyncadd [#allocation5], 4294965248 }
  0x4e   :  { %327 = vsyncpa [#allocation5], 1 }

</bundles_post_ra>
